<compile_context>
chip_gen: v5e
topology: v5e:2x2
jax: 0.10.0
libtpu: 0.0.40
codegen_flags: <defaults>
</compile_context>

<pallas_src>
import math

import jax
import jax.numpy as jnp
from jax.experimental import pallas as pl
from jax.experimental.pallas import tpu as pltpu

_LANE = 128
_MAX_BLOCK_ROWS = 1024     # 1024 x 128 f32 = 512 KiB per input block
_NUM_CORE_SPLITS = 2       # shard the reduction across (up to) 2 TensorCores


def _make_mad_kernel(block_rows: int, blocks_per_core: int, n_valid_rows: int):
    def mad_kernel(a_ref, b_ref, o_ref, acc_ref):
        c = pl.program_id(0)   # parallel (core-split) axis
        j = pl.program_id(1)   # sequential reduction axis

        @pl.when(j == 0)
        def _():
            acc_ref[...] = jnp.zeros_like(acc_ref)

        # Global (unclamped) block index this step logically covers.
        bi = c * blocks_per_core + j

        # Upcast in-register; difference + abs in f32.
        d = jnp.abs(a_ref[...].astype(jnp.float32) - b_ref[...].astype(jnp.float32))

        # Mask rows outside the real array: the ragged last block and any
        # fully-out-of-range "overflow" blocks assigned to the second core
        # (whose index_map is clamped to a valid block).
        row = jax.lax.broadcasted_iota(jnp.int32, d.shape, 0) + bi * block_rows
        acc_ref[...] += jnp.where(row < n_valid_rows, d, 0.0)

        @pl.when(j == pl.num_programs(1) - 1)
        def _():
            # One cross-sublane reduce per core for the whole kernel.
            o_ref[...] = jnp.sum(acc_ref[...], axis=0).reshape(1, 1, _LANE)

    return mad_kernel


def mad(im1, im2, mask=None):
    """Pallas TPU implementation of MAD.forward: mean(|im1 - im2|)."""
    assert im1.shape == im2.shape, "input shape mismatch"
    if mask is not None:
        # TODO(synk): masked per-sample MAD path not implemented in Pallas.
        raise NotImplementedError("mask is not supported by the Pallas MAD kernel")

    n_total = math.prod(im1.shape)
    a = jnp.reshape(im1, (-1,))
    b = jnp.reshape(im2, (-1,))

    # Minimal pad to a multiple of the lane width (only when needed);
    # padded zeros contribute |0 - 0| = 0 to the sum.
    pad = (-n_total) % _LANE
    if pad:
        a = jnp.pad(a, (0, pad))
        b = jnp.pad(b, (0, pad))

    rows = a.shape[0] // _LANE
    a2 = a.reshape(rows, _LANE)
    b2 = b.reshape(rows, _LANE)

    block_rows = rows if rows <= _MAX_BLOCK_ROWS else _MAX_BLOCK_ROWS
    n_blocks = -(-rows // block_rows)
    blocks_per_core = -(-n_blocks // _NUM_CORE_SPLITS)

    def in_map(c, j):
        # Clamp so the DMA always targets a valid block; out-of-range work
        # is fully masked inside the kernel (contributes 0).
        return (jnp.minimum(c * blocks_per_core + j, n_blocks - 1), 0)

    kernel = _make_mad_kernel(block_rows, blocks_per_core, rows)

    in_bytes = im1.dtype.itemsize + im2.dtype.itemsize
    cost = pl.CostEstimate(
        flops=3 * n_total,
        transcendentals=0,
        bytes_accessed=n_total * in_bytes + _NUM_CORE_SPLITS * _LANE * 4,
    )

    partials = pl.pallas_call(
        kernel,
        out_shape=jax.ShapeDtypeStruct((_NUM_CORE_SPLITS, 1, _LANE), jnp.float32),
        grid_spec=pltpu.PrefetchScalarGridSpec(
            num_scalar_prefetch=0,
            grid=(_NUM_CORE_SPLITS, blocks_per_core),
            in_specs=[
                pl.BlockSpec((block_rows, _LANE), in_map),
                pl.BlockSpec((block_rows, _LANE), in_map),
            ],
            out_specs=pl.BlockSpec((1, 1, _LANE), lambda c, j: (c, 0, 0)),
            scratch_shapes=[pltpu.VMEM((block_rows, _LANE), jnp.float32)],
        ),
        compiler_params=pltpu.CompilerParams(
            dimension_semantics=("parallel", "arbitrary"),
        ),
        cost_estimate=cost,
    )(a2, b2)

    # Combine the per-core / per-lane partial sums and take the mean here
    # (tiny scalar work; keeps the kernel free of cross-core communication).
    return jnp.sum(partials) / n_total


if __name__ == "__main__":
    key = jax.random.PRNGKey(0)
    k1, k2 = jax.random.split(key)

    # small NCHW inputs: batch=2, channels=4, spatial=16x16
    im1 = jax.random.uniform(k1, (2, 4, 16, 16), dtype=jnp.float32)
    im2 = jax.random.uniform(k2, (2, 4, 16, 16), dtype=jnp.float32)

    result = mad(im1, im2)
    jax.block_until_ready(result)

    # pure-JAX reference check
    mad_ref = jnp.mean(jnp.abs(im1 - im2))
    assert jnp.allclose(result, mad_ref, rtol=1e-5, atol=1e-6), (result, mad_ref)

    print("KERNEL_OK")
</pallas_src>

<mosaic_0001>
module attributes {stable_mosaic.version = 11 : i64} {
  func.func @mad_kernel(%arg0: i32, %arg1: i32, %arg2: memref<16x128xf32, #tpu.memory_space<vmem>>, %arg3: memref<16x128xf32, #tpu.memory_space<vmem>>, %arg4: memref<1x1x128xf32, #tpu.memory_space<vmem>>, %arg5: memref<16x128xf32, #tpu.memory_space<vmem>>) attributes {dimension_semantics = [#tpu.dimension_semantics<parallel>, #tpu.dimension_semantics<arbitrary>], iteration_bounds = array<i64: 2, 1>, scalar_prefetch = 0 : i64, scratch_operands = 1 : i64, tpu.core_type = #tpu.core_type<tc>, window_params = [{transform_indices = @transform_0, window_bounds = array<i64: 16, 128>}, {transform_indices = @transform_1, window_bounds = array<i64: 16, 128>}, {transform_indices = @transform_2, window_bounds = array<i64: 1, 1, 128>}]} {
    %c0_i32 = arith.constant 0 : i32
    %0 = arith.cmpi eq, %arg1, %c0_i32 : i32
    %1 = arith.extui %0 : i1 to i32
    %c0_i32_0 = arith.constant 0 : i32
    %2 = arith.cmpi ne, %1, %c0_i32_0 : i32
    scf.if %2 {
      %cst_11 = arith.constant 0.000000e+00 : f32
      %23 = vector.broadcast %cst_11 : f32 to vector<16x128xf32>
      %c0_12 = arith.constant 0 : index
      %c0_13 = arith.constant 0 : index
      %24 = vector.load %arg5[%c0_12, %c0_13] : memref<16x128xf32, #tpu.memory_space<vmem>>, vector<16x128xf32>
      tpu.vector_store %arg5[%c0_12, %c0_13], %23 {strides = array<i32>} : memref<16x128xf32, #tpu.memory_space<vmem>>, vector<16x128xf32>,
    } else {
    }
    %c1_i32 = arith.constant 1 : i32
    %3 = arith.muli %arg0, %c1_i32 : i32
    %4 = arith.addi %3, %arg1 : i32
    %c0 = arith.constant 0 : index
    %c0_1 = arith.constant 0 : index
    %5 = vector.load %arg2[%c0, %c0_1] : memref<16x128xf32, #tpu.memory_space<vmem>>, vector<16x128xf32>
    %c0_2 = arith.constant 0 : index
    %c0_3 = arith.constant 0 : index
    %6 = vector.load %arg3[%c0_2, %c0_3] : memref<16x128xf32, #tpu.memory_space<vmem>>, vector<16x128xf32>
    %7 = arith.subf %5, %6 : vector<16x128xf32>
    %8 = math.absf %7 : vector<16x128xf32>
    %9 = tpu.iota {dimensions = array<i32: 0>} : vector<16x128xi32>
    %c16_i32 = arith.constant 16 : i32
    %10 = arith.muli %4, %c16_i32 : i32
    %11 = vector.broadcast %10 : i32 to vector<16x128xi32>
    %12 = arith.addi %9, %11 : vector<16x128xi32>
    %c0_4 = arith.constant 0 : index
    %c0_5 = arith.constant 0 : index
    %13 = vector.load %arg5[%c0_4, %c0_5] : memref<16x128xf32, #tpu.memory_space<vmem>>, vector<16x128xf32>
    %c16_i32_6 = arith.constant 16 : i32
    %14 = vector.broadcast %c16_i32_6 : i32 to vector<16x128xi32>
    %15 = arith.cmpi slt, %12, %14 : vector<16x128xi32>
    %cst = arith.constant 0.000000e+00 : f32
    %16 = vector.broadcast %cst : f32 to vector<16x128xf32>
    %17 = arith.select %15, %8, %16 : vector<16x128xi1>, vector<16x128xf32>
    %18 = arith.addf %13, %17 : vector<16x128xf32>
    %c0_7 = arith.constant 0 : index
    %c0_8 = arith.constant 0 : index
    %19 = vector.load %arg5[%c0_7, %c0_8] : memref<16x128xf32, #tpu.memory_space<vmem>>, vector<16x128xf32>
    tpu.vector_store %arg5[%c0_7, %c0_8], %18 {strides = array<i32>} : memref<16x128xf32, #tpu.memory_space<vmem>>, vector<16x128xf32>,
    %c0_i32_9 = arith.constant 0 : i32
    %20 = arith.cmpi eq, %arg1, %c0_i32_9 : i32
    %21 = arith.extui %20 : i1 to i32
    %c0_i32_10 = arith.constant 0 : i32
    %22 = arith.cmpi ne, %21, %c0_i32_10 : i32
    scf.if %22 {
      %c0_11 = arith.constant 0 : index
      %c0_12 = arith.constant 0 : index
      %23 = vector.load %arg5[%c0_11, %c0_12] : memref<16x128xf32, #tpu.memory_space<vmem>>, vector<16x128xf32>
      %cst_13 = arith.constant dense<0.000000e+00> : vector<128xf32>
      %24 = vector.multi_reduction <add>, %23, %cst_13 [0] : vector<16x128xf32> to vector<128xf32>
      %25 = vector.shape_cast %24 : vector<128xf32> to vector<1x1x128xf32>
      %c0_14 = arith.constant 0 : index
      %c0_15 = arith.constant 0 : index
      %c0_16 = arith.constant 0 : index
      %26 = vector.load %arg4[%c0_14, %c0_15, %c0_16] : memref<1x1x128xf32, #tpu.memory_space<vmem>>, vector<1x1x128xf32>
      tpu.vector_store %arg4[%c0_14, %c0_15, %c0_16], %25 {strides = array<i32>} : memref<1x1x128xf32, #tpu.memory_space<vmem>>, vector<1x1x128xf32>,
    } else {
    }
    return
  }
  func.func @transform_0(%arg0: i32, %arg1: i32) -> (i32, i32) {
    %c1_i32 = arith.constant 1 : i32
    %0 = arith.muli %arg0, %c1_i32 : i32
    %1 = arith.addi %0, %arg1 : i32
    %c0_i32 = arith.constant 0 : i32
    %2 = arith.minsi %1, %c0_i32 : i32
    %c0_i32_0 = arith.constant 0 : i32
    %c0_i32_1 = arith.constant 0 : i32
    return %2, %c0_i32_0 : i32, i32
  }
  func.func @transform_1(%arg0: i32, %arg1: i32) -> (i32, i32) {
    %c1_i32 = arith.constant 1 : i32
    %0 = arith.muli %arg0, %c1_i32 : i32
    %1 = arith.addi %0, %arg1 : i32
    %c0_i32 = arith.constant 0 : i32
    %2 = arith.minsi %1, %c0_i32 : i32
    %c0_i32_0 = arith.constant 0 : i32
    %c0_i32_1 = arith.constant 0 : i32
    return %2, %c0_i32_0 : i32, i32
  }
  func.func @transform_2(%arg0: i32, %arg1: i32) -> (i32, i32, i32) {
    %c0_i32 = arith.constant 0 : i32
    %c0_i32_0 = arith.constant 0 : i32
    %c0_i32_1 = arith.constant 0 : i32
    return %arg0, %c0_i32, %c0_i32_0 : i32, i32, i32
  }
}

</mosaic_0001>

<bundles_post_ra>
// kernel: tpu_custom_call.1
= control target key start
LH: loop header
LB: loop body
LE: loop exit
PB: predicated region body
PF: predicated region fallthrough
CT: control target
= control target key end

     0   :  { %7 = vsyncpa [#allocation4], 0  ;;  %s866_s0 = inlined_call_operand.hbm [shape: f32[16,128], index: 0, kind: input, shape index: {}]   ;;  %s867_s1 = inlined_call_operand.hbm [shape: f32[16,128], index: 1, kind: input, shape index: {}]   ;;  %s868_s2 = inlined_call_operand.hbm [shape: f32[2,1,128], index: 2, kind: output, shape index: {}]  }
   0x1   :  { %9 = vsyncpa [#allocation4 + $0x1], 0 }
   0x2   :  { %10 = vsyncpa [#allocation7], 0 }
   0x3   :  { %12 = vsyncpa [#allocation7 + $0x1], 0 }
   0x4   :  { %13 = vsyncpa [#allocation5], 0 }
   0x5   :  { %15 = vsyncpa [#allocation5 + $0x1], 0  ;;  %s697_s9 = smov 0   ;;  %s699_s10 = smov 0  }
   0x6   :  { %s701_s11 = smov 0   ;;  %s703_s12 = smov 0  }
   0x7   :  { %s705_s13 = smov 0   ;;  %s707_s14 = smov 0  }
   0x8   :  { %s709_s15 = smov 0   ;;  %s711_s16 = smov 0  }
   0x9 LB: > { %s398_s17 = sadd.s32 4294967295, %s676_s16   ;;  %s399_s18 = sadd.s32 4294967294, %s676_s16   ;;  %s676_s16 = sphi %s711_s16, %s21_s16   ;;  %s672_s15 = sphi %s709_s15, %s880_s15   ;;  %s668_s14 = sphi %s707_s14, %s879_s14   ;;  %s664_s13 = sphi %s705_s13, %s856_s13   ;;  %s660_s12 = sphi %s703_s12, %s878_s12   ;;  %s656_s11 = sphi %s701_s11, %s877_s11   ;;  %s652_s10 = sphi %s699_s10, %s876_s10   ;;  %s648_s9 = sphi %s697_s9, %s875_s9  }
   0xa   : > { %s33_s19 = sadd.s32 1, %s672_s15  ;;  %p645_p1 = scmp.ne.s32.totalorder %s664_s13, 0 }
   0xb   : > { %p35_p0 = scmp.ge.s32.totalorder %s33_s19, 2  ;;  %p54_p2 = scmp.eq.s32.totalorder %s676_s16, 0 }
   0xc   : > { %p59_p3 = scmp.ne.s32.totalorder %s664_s13, %s660_s12  ;;  %p60_p5 = scmp.eq.s32.totalorder %s398_s17, 0 }
   0xd   : > { %s882_s19 = smov (%p35_p0, %s33_s19), 0  ;;  %p743_p4 = por %p645_p1, %p54_p2 }
   0xe   : > { %p747_p6 = por %p60_p5, %p59_p3  ;;  %s101_s22 = ssub.s32 %s672_s15, %s882_s19 }
   0xf   : > { %p102_p7 = scmp.eq.s32.totalorder %s101_s22, 0  ;;  %s104_s23 = sadd.s32 1, %s656_s11 }
  0x10   : > { %p114_p8 = scmp.ne.s32.totalorder %s656_s11, %s652_s10  ;;  %p115_p9 = scmp.eq.s32.totalorder %s398_s17, 1 }
  0x11   : > { %s755_s24 = scalar_select %p102_p7, %s656_s11, %s104_s23  }
  0x12   : > { %p120_p10 = scmp.ne.s32.totalorder %s652_s10, %s648_s9  ;;  %p121_p11 = scmp.eq.s32.totalorder %s399_s18, 1 }
  0x13   : > { %p761_p12 = por %p115_p9, %p114_p8  ;;  %p401_p13 = scmp.ge.s32.totalorder %s676_s16, 2 }
  0x14   : > { %p766_p0 = por %p121_p11, %p120_p10  ;;  %p433_p1 = scmp.lt.s32.totalorder %s676_s16, 2 }
  0x15   : > { %s154_s29 = sshll.u32 %s866_s0, 4  ;;  %s678_s30 = smov [#allocation3]   ;;  %s155_s29 = int_to_ptr.hbm [resolvable:$true] %s154_s29 }
  0x16   : > { %s156_s3 = sshll.u32 %s678_s30, 4  ;;  %p776_p2 = pnand %p433_p1, %p743_p4  ;;  %s157_s3 = int_to_ptr.vmem [resolvable:$true] %s156_s3 }
  0x17   : > { %p408_p3 = scmp.ge.s32.totalorder %s676_s16, 1  ;;  %p189_p5 = scmp.lt.s32.totalorder %s676_s16, 3 }
  0x18   : > { %s509_s5 = sshra.s32 %s155_s29, 4  ;;  %p513_p8 = pneg %p776_p2  ;;  %s510_s5 = int_to_ptr.hbm [resolvable:$true] %s509_s5 }
  0x19   : > { %s511_s6 = scalar_lea.hbm %s510_s5, 16  ;;  %s516_s12 = scalar_lea.hbm %s866_s0, 16 }
  0x1a   : > { %p512_p7 = scmp.ne.s32.totalorder %s510_s5, %s511_s6  ;;  %p518_p4 = scmp.lt.s32.totalorder %s516_s12, %s511_s6 }
  0x1c   : > { %p514_p9 = pnand %p513_p8, %p512_p7 }
  0x1e   : > { %p515_p10 = pneg %p514_p9 }
  0x20   : > { %p520_p11 = pnand %p518_p4, %p515_p10 }
  0x22   : > { %523 = shalt.err (!%p520_p11)
}
  0x23   : > { %s679_s17 = smov 128   ;;  %s680_s18 = smov 8  }
  0x24   : > { %425 = dma.hbm_to_vmem [thread:$0]  (!%p776_p2), %s155_s29, 256, %s157_s3, [#allocation4], %s679_s17, %s679_s17, %s680_s18  }
  0x25   : > { %p796_p1 = pnand %p408_p3, %p189_p5  ;;  %s179_s27 = sshll.u32 %s867_s1, 4  ;;  %s180_s27 = int_to_ptr.hbm [resolvable:$true] %s179_s27 }
  0x26   : > { %s681_s28 = smov [#allocation6]   ;;  %s539_s5 = sshra.s32 %s180_s27, 4  ;;  %s540_s5 = int_to_ptr.hbm [resolvable:$true] %s539_s5 }
  0x27   : > { %s181_s30 = sshll.u32 %s681_s28, 4  ;;  %s541_s6 = scalar_lea.hbm %s540_s5, 16  ;;  %s182_s30 = int_to_ptr.vmem [resolvable:$true] %s181_s30 }
  0x28   : > { %p542_p7 = scmp.ne.s32.totalorder %s540_s5, %s541_s6  ;;  %s546_s7 = scalar_lea.hbm %s867_s1, 16 }
  0x29   : > { %p548_p3 = scmp.lt.s32.totalorder %s546_s7, %s541_s6 }
  0x2a   : > { %p544_p9 = pnand %p542_p7, %p513_p8 }
  0x2c   : > { %p545_p10 = pneg %p544_p9 }
  0x2e   : > { %p550_p5 = pnand %p548_p3, %p545_p10 }
  0x30   : > { %553 = shalt.err (!%p550_p5)
}
  0x31   : > { %428 = dma.hbm_to_vmem [thread:$0]  (!%p776_p2), %s180_s27, 256, %s182_s30, [#allocation7], %s679_s17, %s679_s17, %s680_s18  }
  0x32   : > { %193 = sbr.rel (%p796_p1) target bundleno = 85 (0x55), region = 28  ;;  %s195_s8 = sand.u32 (!%p796_p1), 1, %s664_s13  }
  0x33   : > { %s409_s12 = sshll.u32 (!%p796_p1), %s195_s8, 4  ;;  %s196_s22 = scalar_lea.sflag (!%p796_p1), [#allocation4], %s195_s8 }
  0x34   : > { %s199_s23 = scalar_lea.vmem (!%p796_p1), [#allocation3], %s409_s12 }
  0x37   : > { %634 = dma.done.wait (%p747_p6), %s196_s22, 256  }
  0x38   : > { %636 = vsyncadd (%p747_p6), %s196_s22, 4294967040  ;;  %s206_s28 = scalar_lea.sflag [#allocation7], %s195_s8  ;;  %s209_s5 = scalar_lea.vmem [#allocation6], %s409_s12 }
  0x39   : > { %638 = dma.done.wait (%p747_p6), %s206_s28, 256  }
  0x3a   : > { %640 = vsyncadd (%p747_p6), %s206_s28, 4294967040  ;;  %v258_v0 = vlaneseq  ;;  %s411_s4 = sshll.u32 %s668_s14, 4  ;;  %v250_v6 = vld [vmem:[%s199_s23] sm:$0xff]  ;;  %v251_v7 = vld [vmem:[%s199_s23 + $0x8] sm:$0xff]  ;;  %s233_s21 = sand.u32 1, %s652_s10  }
  0x3b   : > { %v262_v2 = vstv %s411_s4  ;;  %v252_v8 = vld [vmem:[%s209_s5] sm:$0xff]  ;;  %v253_v9 = vld [vmem:[%s209_s5 + $0x8] sm:$0xff]  ;;  %s297_s20 = scalar_lea.hbm %s868_s2, %s668_s14  ;;  %s234_s27 = scalar_lea.vmem [#allocation8], %s233_s21 }
  0x3c   : > { %v259_v1 = vshrl.u32 %v258_v0, 7  ;;  %v254_v10 = vsub.f32 %v250_v6, %v252_v8  ;;  %v255_v11 = vsub.f32 %v251_v7, %v253_v9  ;;  %s299_s30 = sshll.u32 %s234_s27, 4  ;;  %s301_s6 = sshll.u32 %s297_s20, 4  ;;  %s300_s30 = int_to_ptr.vmem [resolvable:$true] %s299_s30  ;;  %s302_s6 = int_to_ptr.hbm [resolvable:$true] %s301_s6 }
  0x3d   : > { %s289_s29 = scalar_lea.sflag [#allocation5], %s233_s21  ;;  %s583_s3 = sshra.s32 %s302_s6, 4  ;;  %s584_s3 = int_to_ptr.hbm [resolvable:$true] %s583_s3 }
  0x3e   : > { %v260_v3 = vadd.s32 8, %v259_v1  ;;  %v263_v4 = vadd.s32 %v262_v2, %v259_v1  ;;  %v256_v12 = vand.u32 2147483647, %v254_v10  ;;  %v257_v13 = vand.u32 2147483647, %v255_v11  ;;  %s585_s7 = scalar_lea.hbm %s584_s3, 1  ;;  %p590_p4 = scmp.lt.s32.totalorder %s584_s3, %s868_s2 }
  0x3f   : > { %p586_p6 = scmp.ne.s32.totalorder %s584_s3, %s585_s7  ;;  %s589_s14 = scalar_lea.hbm %s868_s2, 2 }
  0x40   : > { %v264_v5 = vadd.s32 %v262_v2, %v260_v3  ;;  %vm267_vm0 = vcmp.lt.s32.totalorder %v263_v4, 16  ;;  %p591_p11 = scmp.lt.s32.totalorder %s589_s14, %s585_s7 }
  0x41   : > { %v269_v14 = vsel %vm267_vm0, %v256_v12, 0.0  ;;  %p587_p2 = pnand %p586_p6, %p761_p12 }
  0x42   : > { %vm268_vm1 = vcmp.lt.s32.totalorder %v264_v5, 16  ;;  %p592_p1 = por %p591_p11, %p590_p4 }
  0x43   : > { %v270_v15 = vsel %vm268_vm1, %v257_v13, 0.0  ;;  %p588_p8 = pneg %p587_p2 }
  0x44   : > { %v280_v16 = vadd.f32 %v270_v15, %v269_v14 }
  0x45   : > { %p593_p7 = pnand %p592_p1, %p588_p8 }
  0x46   : > { %v281_v17 = vrot.slane %v280_v16, 4 }
  0x48   : > { %v282_v18 = vadd.f32 %v281_v17, %v280_v16 }
  0x4a   : > { %v283_v19 = vrot.slane %v282_v18, 2 }
  0x4c   : > { %v284_v20 = vadd.f32 %v283_v19, %v282_v18 }
  0x4e   : > { %v285_v21 = vrot.slane %v284_v20, 1 }
  0x50   : > { %v286_v22 = vadd.f32 %v285_v21, %v284_v20 }
  0x52   : > { %287 = vst [vmem:[%s234_s27] sm:$0x1] %v286_v22 }
  0x53   : > { %596 = shalt.err (!%p593_p7)
}
  0x54   : > { %420 = dma.vmem_to_hbm [thread:$0]  (%p761_p12), %s300_s30, 16, %s302_s6, %s289_s29  }
  0x55 PF: > { %s313_s28 = sand.u32 1, %s648_s9   ;;  %p430_p9 = pnand %p401_p13, %p766_p0 }
  0x56   : > { %s314_s5 = scalar_lea.sflag [#allocation5], %s313_s28 }
  0x57   : > { %p431_p10 = pneg %p430_p9 }
  0x59   : > { %642 = dma.done.wait (%p431_p10), %s314_s5, 16  }
  0x5a   : > { %644 = vsyncadd (%p431_p10), %s314_s5, 4294967280  ;;  %s21_s16 = sadd.s32 1, %s676_s16   ;;  %s875_s9 = smov %s652_s10 }
  0x5b   : > { %p18_p3 = scmp.ge.s32.totalorder %s21_s16, 4   ;;  %s876_s10 = smov %s656_s11 }
  0x5c   : > { %s877_s11 = smov %s755_s24  ;;  %s878_s12 = smov %s664_s13 }
  0x5d   : > { %s856_s13 = smov 0   ;;  %s879_s14 = smov %s672_s15 }
  0x5e   : > { %s880_s15 = smov %s882_s19  ;;  %20 = sbr.rel (!%p18_p3) target bundleno = 9 (0x9), region = 94 }
  0x63   :  { %319 = vsyncpa [#allocation4], 1 }
  0x64   :  { %321 = vsyncpa [#allocation4 + $0x1], 1 }
  0x65   :  { %322 = vsyncpa [#allocation7], 1 }
  0x66   :  { %324 = vsyncpa [#allocation7 + $0x1], 1 }
  0x67   :  { %325 = vsyncpa [#allocation5], 1 }
  0x68   :  { %327 = vsyncpa [#allocation5 + $0x1], 1 }

</bundles_post_ra>
